<compile_context>
chip_gen: v7x
topology: tpu7x:2x2x1
jax: 0.10.0
libtpu: 0.0.40
codegen_flags: <defaults>
</compile_context>

<pallas_src>
import jax
import jax.numpy as jnp
from jax import lax
from jax.experimental import pallas as pl
from jax.experimental.pallas import tpu as pltpu


def _crossover_fitness_kernel(pa_ref, pb_ref, d_ref, child_ref, fit_ref):
    # pa_ref, pb_ref : (L, B) int32   parent A / B tours, position-major / pair-minor
    # d_ref          : (N, N)         distance matrix (bf16 or f32)
    # child_ref      : (2, L, B) int32  children (lane-dense store)
    # fit_ref        : (2, B) float32   closed-tour length of each child
    L, B = pa_ref.shape
    N = d_ref.shape[0]
    cut = L // 2

    pa = pa_ref[...]
    pb = pb_ref[...]
    d = d_ref[...]

    # --- one-point crossover at L // 2 (operand-swapped selects, no broadcast) ---
    keep_a = lax.broadcasted_iota(jnp.int32, (L, B), 0) < cut
    c1 = jnp.where(keep_a, pa, pb)               # (L, B) int32
    c2 = jnp.where(keep_a, pb, pa)               # (L, B) int32
    cur = jnp.stack([c1, c2], axis=0)            # (2, L, B) int32

    # single lane-dense int32 store of both children (B pairs on the lane axis)
    child_ref[...] = cur

    # "next city" of every tour position: roll the children along the position
    # axis in-kernel (replaces the rolled-parent inputs of the old revision).
    nxt = jnp.roll(cur, -1, axis=1)              # (2, L, B) int32

    # --- fitness: one MXU matmul gathers D rows, a bool mask picks the edge ---
    lane_n = lax.broadcasted_iota(jnp.int32, (2, L, B, N), 3)
    oh_cur = (cur[..., None] == lane_n).astype(d.dtype)      # one-hot, exact in bf16
    # rows of t are D[g_i, :] for every (child, position, pair)
    t = jnp.dot(oh_cur.reshape(2 * L * B, N), d,
                preferred_element_type=jnp.float32).reshape(2, L, B, N)
    e = jnp.where(nxt[..., None] == lane_n, t, 0.0)          # picks D[g_i, g_{(i+1)%L}]
    # reduce tour positions first (VPU adds over L planes), then the N lanes of
    # the tiny (2, B, N) remainder (cheap cross-lane reduce).
    fit_ref[...] = jnp.sum(jnp.sum(e, axis=1), axis=-1)      # (2, B) f32


def _pick_vmem_limit():
    try:
        cap = int(pltpu.get_tpu_info().vmem_capacity_bytes)
    except Exception:  # pragma: no cover - conservative fallback
        cap = 128 << 20
    # leave compiler-scratch headroom: ~48 MiB on v7x (64 MiB physical),
    # ~96-100 MiB on v5e/v6e (128 MiB physical).
    return max(32 << 20, min(cap * 3 // 4, 100 << 20))


def _pick_pair_block(num_pairs):
    if num_pairs <= 128:
        return num_pairs                       # one full-extent block
    # >= 2 grid steps (keeps both v7x TensorCores busy), lane-aligned blocks,
    # at most 512 pairs/step so the (2, L, B, N) temporaries stay small.
    cap = min(512, num_pairs // 2)
    for cand in (512, 384, 256, 128):
        if cand <= cap and num_pairs % cand == 0:
            return cand
    return num_pairs                           # awkward sizes: single block


def crossover_forward(parents, dist_matrix, *, pair_block=None,
                      dot_dtype=jnp.bfloat16):
    """parents: (P, L) integer city tours; dist_matrix: (N, N) float32.

    Returns (children, fitness): children (P, L) int32 (two children per
    consecutive parent pair, one-point crossover at L//2), fitness (P,) float32
    closed-tour length of each child.  Pass dot_dtype=jnp.float32 for exact
    (un-rounded) euclidean tour lengths.
    """
    P, L = parents.shape
    N = dist_matrix.shape[0]
    assert P % 2 == 0, "need an even number of parents"
    num_pairs = P // 2

    B = _pick_pair_block(num_pairs) if pair_block is None else pair_block
    assert num_pairs % B == 0, "num_pairs must be a multiple of pair_block"
    assert B == num_pairs or B % 128 == 0, "pair_block must be full or 128-aligned"

    parents = parents.astype(jnp.int32)
    # position-major / pair-minor layout: the pair axis (>=128 for big runs)
    # is the lane axis of every kernel load and store.
    paT = parents[0::2].T                       # (L, num_pairs)
    pbT = parents[1::2].T                       # (L, num_pairs)
    d = dist_matrix.astype(dot_dtype)           # one-hot operand is exact in bf16

    children2, fit2 = pl.pallas_call(
        _crossover_fitness_kernel,
        out_shape=(
            jax.ShapeDtypeStruct((2, L, num_pairs), jnp.int32),
            jax.ShapeDtypeStruct((2, num_pairs), jnp.float32),
        ),
        grid_spec=pltpu.PrefetchScalarGridSpec(
            num_scalar_prefetch=0,
            grid=(num_pairs // B,),
            in_specs=[
                pl.BlockSpec((L, B), lambda i: (0, i)),
                pl.BlockSpec((L, B), lambda i: (0, i)),
                pl.BlockSpec((N, N), lambda i: (0, 0)),      # resident D tile
            ],
            out_specs=(
                pl.BlockSpec((2, L, B), lambda i: (0, 0, i)),
                pl.BlockSpec((2, B), lambda i: (0, i)),
            ),
        ),
        compiler_params=pltpu.CompilerParams(
            dimension_semantics=("parallel",),
            vmem_limit_bytes=_pick_vmem_limit(),
        ),
    )(paT, pbT, d)

    # back to pair-major interleaved order: children[2p + c] = child c of pair p
    children = children2.transpose(2, 0, 1).reshape(P, L)
    fitness = fit2.T.reshape(P)
    return children, fitness


def _reference(parents, dist_matrix):
    P, L = parents.shape
    cut = L // 2
    pairs = parents.reshape(P // 2, 2, L)
    c1 = jnp.concatenate([pairs[:, 0, :cut], pairs[:, 1, cut:]], axis=-1)
    c2 = jnp.concatenate([pairs[:, 1, :cut], pairs[:, 0, cut:]], axis=-1)
    children = jnp.stack([c1, c2], axis=1).reshape(P, L)
    nxt = jnp.roll(children, -1, axis=-1)
    fitness = jnp.sum(dist_matrix[children, nxt], axis=-1)
    return children, fitness


def _check(parents, dist_matrix, dot_dtype):
    children, fitness = crossover_forward(parents, dist_matrix,
                                          dot_dtype=dot_dtype)
    jax.block_until_ready((children, fitness))
    # reference uses D rounded the same way the kernel's dot operand is rounded
    d_chk = dist_matrix.astype(dot_dtype).astype(jnp.float32)
    ref_children, ref_fitness = _reference(parents, d_chk)
    assert jnp.array_equal(children, ref_children), "children mismatch"
    assert jnp.allclose(fitness, ref_fitness, rtol=1e-5, atol=1e-4), "fitness mismatch"


if __name__ == "__main__":
    key = jax.random.PRNGKey(0)
    L = 16                    # tour length
    N = L                     # cities 0..15
    k_coords, k_perm = jax.random.split(key)

    # deterministic "distance_metric": euclidean distances between random cities
    coords = jax.random.uniform(k_coords, (N, 2), dtype=jnp.float32)
    diff = coords[:, None, :] - coords[None, :, :]
    dist_matrix = jnp.sqrt(jnp.sum(diff * diff, axis=-1)).astype(jnp.float32)

    def make_parents(k, num_parents):
        keys = jax.random.split(k, num_parents)
        perms = jax.vmap(lambda kk: jax.random.permutation(kk, L))(keys)
        return perms.astype(jnp.int32)

    k_small, k_big = jax.random.split(k_perm)

    # small case: P=8 parents -> 4 pairs, one full-extent block (grid = 1)
    parents_small = make_parents(k_small, 8)
    _check(parents_small, dist_matrix, jnp.bfloat16)

    # batched case: P=512 parents -> 256 pairs, pair_block=128 -> grid = 2,
    # lane-dense (2,16,128) child stores and a (4096,16)@(16,16) matmul/step
    parents_big = make_parents(k_big, 512)
    _check(parents_big, dist_matrix, jnp.bfloat16)

    print("KERNEL_OK")
</pallas_src>

<mosaic_0001>
module attributes {stable_mosaic.version = 11 : i64} {
  func.func @_crossover_fitness_kernel(%arg0: i32, %arg1: memref<16x4xi32, #tpu.memory_space<vmem>>, %arg2: memref<16x4xi32, #tpu.memory_space<vmem>>, %arg3: memref<16x16xbf16, #tpu.memory_space<vmem>>, %arg4: memref<2x16x4xi32, #tpu.memory_space<vmem>>, %arg5: memref<2x4xf32, #tpu.memory_space<vmem>>) attributes {dimension_semantics = [#tpu.dimension_semantics<parallel>], iteration_bounds = array<i64: 1>, scalar_prefetch = 0 : i64, scratch_operands = 0 : i64, tpu.core_type = #tpu.core_type<tc>, window_params = [{transform_indices = @transform_0, window_bounds = array<i64: 16, 4>}, {transform_indices = @transform_1, window_bounds = array<i64: 16, 4>}, {pipeline_mode = #tpu.pipeline_mode<synchronous>, transform_indices = @transform_2, window_bounds = array<i64: 16, 16>}, {transform_indices = @transform_3, window_bounds = array<i64: 2, 16, 4>}, {transform_indices = @transform_4, window_bounds = array<i64: 2, 4>}]} {
    %c0 = arith.constant 0 : index
    %c0_0 = arith.constant 0 : index
    %0 = vector.load %arg1[%c0, %c0_0] : memref<16x4xi32, #tpu.memory_space<vmem>>, vector<16x4xi32>
    %c0_1 = arith.constant 0 : index
    %c0_2 = arith.constant 0 : index
    %1 = vector.load %arg2[%c0_1, %c0_2] : memref<16x4xi32, #tpu.memory_space<vmem>>, vector<16x4xi32>
    %c0_3 = arith.constant 0 : index
    %c0_4 = arith.constant 0 : index
    %2 = vector.load %arg3[%c0_3, %c0_4] : memref<16x16xbf16, #tpu.memory_space<vmem>>, vector<16x16xbf16>
    %3 = tpu.iota {dimensions = array<i32: 0>} : vector<16x4xi32>
    %c8_i32 = arith.constant 8 : i32
    %4 = vector.broadcast %c8_i32 : i32 to vector<16x4xi32>
    %5 = arith.cmpi slt, %3, %4 : vector<16x4xi32>
    %6 = arith.select %5, %0, %1 : vector<16x4xi1>, vector<16x4xi32>
    %7 = arith.select %5, %1, %0 : vector<16x4xi1>, vector<16x4xi32>
    %8 = vector.shape_cast %6 : vector<16x4xi32> to vector<1x16x4xi32>
    %9 = vector.shape_cast %7 : vector<16x4xi32> to vector<1x16x4xi32>
    %10 = tpu.concatenate %8, %9 in 0 : vector<1x16x4xi32>, vector<1x16x4xi32> -> vector<2x16x4xi32>
    %c0_5 = arith.constant 0 : index
    %c0_6 = arith.constant 0 : index
    %c0_7 = arith.constant 0 : index
    %11 = vector.load %arg4[%c0_5, %c0_6, %c0_7] : memref<2x16x4xi32, #tpu.memory_space<vmem>>, vector<2x16x4xi32>
    tpu.vector_store %arg4[%c0_5, %c0_6, %c0_7], %10 {strides = array<i32>} : memref<2x16x4xi32, #tpu.memory_space<vmem>>, vector<2x16x4xi32>,
    %12 = vector.extract_strided_slice %10 {offsets = [0, 1, 0], sizes = [2, 15, 4], strides = [1, 1, 1]} : vector<2x16x4xi32> to vector<2x15x4xi32>
    %13 = vector.extract_strided_slice %10 {offsets = [0, 0, 0], sizes = [2, 1, 4], strides = [1, 1, 1]} : vector<2x16x4xi32> to vector<2x1x4xi32>
    %14 = tpu.concatenate %12, %13 in 1 : vector<2x15x4xi32>, vector<2x1x4xi32> -> vector<2x16x4xi32>
    %15 = tpu.iota {dimensions = array<i32: 3>} : vector<2x16x4x16xi32>
    %16 = vector.shape_cast %10 : vector<2x16x4xi32> to vector<2x16x4x1xi32>
    %17 = vector.broadcast %16 : vector<2x16x4x1xi32> to vector<2x16x4x16xi32>
    %18 = arith.cmpi eq, %17, %15 : vector<2x16x4x16xi32>
    %19 = arith.extui %18 : vector<2x16x4x16xi1> to vector<2x16x4x16xi32>
    %20 = arith.sitofp %19 : vector<2x16x4x16xi32> to vector<2x16x4x16xf32>
    %21 = arith.truncf %20 : vector<2x16x4x16xf32> to vector<2x16x4x16xbf16>
    %22 = vector.shape_cast %21 : vector<2x16x4x16xbf16> to vector<128x16xbf16>
    %cst = arith.constant dense<0.000000e+00> : vector<128x16xf32>
    %23 = tpu.matmul %22, %2, %cst {dimension_numbers = #tpu.dot_dimension_numbers<[1], [0], [0], [1], [0, 0, 1, 1], [], []>} : vector<128x16xbf16>, vector<16x16xbf16>, vector<128x16xf32> -> vector<128x16xf32>
    %24 = vector.shape_cast %23 : vector<128x16xf32> to vector<2x16x4x16xf32>
    %25 = vector.shape_cast %14 : vector<2x16x4xi32> to vector<2x16x4x1xi32>
    %26 = vector.broadcast %25 : vector<2x16x4x1xi32> to vector<2x16x4x16xi32>
    %27 = arith.cmpi eq, %26, %15 : vector<2x16x4x16xi32>
    %cst_8 = arith.constant 0.000000e+00 : f32
    %28 = vector.broadcast %cst_8 : f32 to vector<2x16x4x16xf32>
    %29 = arith.select %27, %24, %28 : vector<2x16x4x16xi1>, vector<2x16x4x16xf32>
    %cst_9 = arith.constant dense<0.000000e+00> : vector<2x4x16xf32>
    %30 = vector.multi_reduction <add>, %29, %cst_9 [1] : vector<2x16x4x16xf32> to vector<2x4x16xf32>
    %cst_10 = arith.constant dense<0.000000e+00> : vector<2x4xf32>
    %31 = vector.multi_reduction <add>, %30, %cst_10 [2] : vector<2x4x16xf32> to vector<2x4xf32>
    %c0_11 = arith.constant 0 : index
    %c0_12 = arith.constant 0 : index
    %32 = vector.load %arg5[%c0_11, %c0_12] : memref<2x4xf32, #tpu.memory_space<vmem>>, vector<2x4xf32>
    tpu.vector_store %arg5[%c0_11, %c0_12], %31 {strides = array<i32>} : memref<2x4xf32, #tpu.memory_space<vmem>>, vector<2x4xf32>,
    return
  }
  func.func @transform_0(%arg0: i32) -> (i32, i32) {
    %c0_i32 = arith.constant 0 : i32
    %c0_i32_0 = arith.constant 0 : i32
    return %c0_i32, %arg0 : i32, i32
  }
  func.func @transform_1(%arg0: i32) -> (i32, i32) {
    %c0_i32 = arith.constant 0 : i32
    %c0_i32_0 = arith.constant 0 : i32
    return %c0_i32, %arg0 : i32, i32
  }
  func.func @transform_2(%arg0: i32) -> (i32, i32) {
    %c0_i32 = arith.constant 0 : i32
    %c0_i32_0 = arith.constant 0 : i32
    %c0_i32_1 = arith.constant 0 : i32
    return %c0_i32, %c0_i32_0 : i32, i32
  }
  func.func @transform_3(%arg0: i32) -> (i32, i32, i32) {
    %c0_i32 = arith.constant 0 : i32
    %c0_i32_0 = arith.constant 0 : i32
    %c0_i32_1 = arith.constant 0 : i32
    return %c0_i32, %c0_i32_0, %arg0 : i32, i32, i32
  }
  func.func @transform_4(%arg0: i32) -> (i32, i32) {
    %c0_i32 = arith.constant 0 : i32
    %c0_i32_0 = arith.constant 0 : i32
    return %c0_i32, %arg0 : i32, i32
  }
}

</mosaic_0001>

<bundles_post_ra>
// kernel: tpu_custom_call.1
= control target key start
LH: loop header
LB: loop body
LE: loop exit
PB: predicated region body
PF: predicated region fallthrough
CT: control target
= control target key end

     0   :  { %10 = vsyncpa [#allocation3], 0  ;;  %s1917_s0 = inlined_call_operand.hbm [shape: s32[16,4], index: 0, kind: input, shape index: {}]   ;;  %s1918_s1 = inlined_call_operand.hbm [shape: s32[16,4], index: 1, kind: input, shape index: {}]   ;;  %s1919_s2 = inlined_call_operand.hbm [shape: bf16[16,16], index: 2, kind: input, shape index: {}]   ;;  %s1920_s3 = inlined_call_operand.hbm [shape: s32[2,16,4], index: 3, kind: output, shape index: {0}]   ;;  %s1921_s4 = inlined_call_operand.hbm [shape: f32[2,4], index: 4, kind: output, shape index: {1}]  }
   0x1   :  { %11 = vsyncpa [#allocation6], 0 }
   0x2   :  { %12 = vsyncpa [#allocation4], 0 }
   0x3   :  { %13 = vsyncpa [#allocation10], 0  ;;  %s1407_s15 = smov [#allocation5]   ;;  %s1408_s17 = smov [#allocation2]  }
   0x4   :  { %s31_s16 = sshll.u32 %s1407_s15, 4  ;;  %s19_s18 = sshll.u32 %s1408_s17, 4  ;;  %s32_s16 = int_to_ptr.vmem [resolvable:$true] %s31_s16  ;;  %s1443_s18 = int_to_ptr.vmem [resolvable:$true] %s19_s18 }
   0x5   :  { %s1289_s21 = scalar_lea.hbm %s1918_s1, 256 }
   0x6   :  { %p1290_p0 = scmp.ne.s32.totalorder %s1918_s1, %s1289_s21  ;;  %p1293_p1 = scmp.lt.u32.totalorder %s1289_s21, %s1918_s1 }
   0x8   :  { %p1295_p2 = pnand %p1293_p1, %p1290_p0 }
   0xa   :  { %1298 = shalt.err (!%p1295_p2)
}
   0xb   :  { %s1299_s26 = scalar_lea.vmem %s32_s16, 256  ;;  %p1304_p4 = scmp.lt.s32.totalorder %s32_s16, %s32_s16 }
   0xc   :  { %p1300_p3 = scmp.ne.s32.totalorder %s32_s16, %s1299_s26  ;;  %p1305_p5 = scmp.lt.s32.totalorder %s1299_s26, %s1299_s26 }
   0xe   :  { %p1306_p6 = por %p1305_p5, %p1304_p4 }
  0x10   :  { %p1307_p7 = pnand %p1306_p6, %p1300_p3 }
  0x12   :  { %1310 = shalt.err (!%p1307_p7)
}
  0x13   :  { %s1409_s27 = smov 128   ;;  %s1410_s28 = smov 8  }
  0x14   :  { %37 = dma.hbm_to_vmem [thread:$0]  %s1918_s1, 256, %s32_s16, [#allocation6], %s1409_s27, %s1409_s27, %s1410_s28  }
  0x15   :  { %s1311_s7 = scalar_lea.hbm %s1917_s0, 256 }
  0x16   :  { %p1312_p8 = scmp.ne.s32.totalorder %s1917_s0, %s1311_s7  ;;  %p1315_p9 = scmp.lt.u32.totalorder %s1311_s7, %s1917_s0 }
  0x18   :  { %p1317_p10 = pnand %p1315_p9, %p1312_p8 }
  0x1a   :  { %1320 = shalt.err (!%p1317_p10)
}
  0x1b   :  { %s1321_s12 = scalar_lea.vmem %s1443_s18, 256  ;;  %p1326_p12 = scmp.lt.s32.totalorder %s1443_s18, %s1443_s18 }
  0x1c   :  { %p1322_p11 = scmp.ne.s32.totalorder %s1443_s18, %s1321_s12  ;;  %p1327_p13 = scmp.lt.s32.totalorder %s1321_s12, %s1321_s12 }
  0x1e   :  { %p1328_p0 = por %p1327_p13, %p1326_p12 }
  0x20   :  { %p1329_p1 = pnand %p1328_p0, %p1322_p11 }
  0x22   :  { %1332 = shalt.err (!%p1329_p1)
}
  0x23   :  { %25 = dma.hbm_to_vmem [thread:$0]  %s1917_s0, 256, %s1443_s18, [#allocation3], %s1409_s27, %s1409_s27, %s1410_s28  }
  0x24   :  { %s1411_s14 = smov [#allocation7]   ;;  %s1333_s19 = scalar_lea.hbm %s1919_s2, 128 }
  0x25   :  { %s43_s15 = sshll.u32 %s1411_s14, 4  ;;  %p1334_p2 = scmp.ne.s32.totalorder %s1919_s2, %s1333_s19  ;;  %s44_s15 = int_to_ptr.vmem [resolvable:$true] %s43_s15 }
  0x26   :  { %p1337_p3 = scmp.lt.u32.totalorder %s1333_s19, %s1919_s2 }
  0x28   :  { %p1339_p4 = pnand %p1337_p3, %p1334_p2 }
  0x2a   :  { %1342 = shalt.err (!%p1339_p4)
}
  0x2b   :  { %s1343_s24 = scalar_lea.vmem %s44_s15, 128  ;;  %p1348_p6 = scmp.lt.s32.totalorder %s44_s15, %s44_s15 }
  0x2c   :  { %p1344_p5 = scmp.ne.s32.totalorder %s44_s15, %s1343_s24  ;;  %p1349_p7 = scmp.lt.s32.totalorder %s1343_s24, %s1343_s24 }
  0x2e   :  { %p1350_p8 = por %p1349_p7, %p1348_p6 }
  0x30   :  { %p1351_p9 = pnand %p1350_p8, %p1344_p5 }
  0x32   :  { %1354 = shalt.err (!%p1351_p9)
}
  0x33   :  { %s1412_s0 = smov 64   ;;  %s1413_s18 = smov 4  }
  0x34   :  { %49 = dma.hbm_to_vmem [thread:$0]  %s1919_s2, 128, %s44_s15, [#allocation6], %s1412_s0, %s1412_s0, %s1413_s18  }
  0x35   :  { %1399 = dma.done.wait [#allocation3], 256  }
  0x36   :  { %1400 = vsyncadd [#allocation3], 4294967040 }
  0x37   :  { %1401 = dma.done.wait [#allocation6], 384  }
  0x38   :  { %1402 = vsyncadd [#allocation6], 4294966912  ;;  %v89_v0 = vlaneseq  ;;  %v1507_v6 = vld [vmem:[#allocation2] sm:$0xff]  ;;  %v1517_v11 = vld [vmem:[#allocation5] sm:$0xff]  ;;  %vm80_vm0 = vcmask 1046528   ;;  %vm617_vm7 = vcmask 130048  }
  0x39   :  { %v1288_v18 = vld [vmem:[#allocation7] sm:$0xff]   ;;  %v1555_v29 = vld [vmem:[#allocation5 + $0x8] sm:$0xff]  ;;  %v1565_v34 = vld [vmem:[#allocation2 + $0x8] sm:$0xff]  ;;  %v81_v45 = vrot.slane %v1507_v6, 1  ;;  %v84_v50 = vrot.slane %v1517_v11, 1  ;;  %s1416_s2 = smov [#allocation8]  }
  0x3a   :  { %v1493_v1 = vshrl.u32 %v89_v0, 7  ;;  %1257 = vmatprep.subr.bf16.mxu0 %v1288_v18  ;;  %1275 = vmatprep.subr.bf16.mxu1 %v1288_v18  ;;  %v82_v46 = vrot.slane %v1555_v29, 1  ;;  %v85_v51 = vrot.slane %v1565_v34, 1  ;;  %s1164_s29 = sshll.u32 %s1416_s2, 4  ;;  %s1165_s29 = int_to_ptr.vmem [resolvable:$true] %s1164_s29 }
  0x3b   :  { %1258 = vmatpush3.bf16.msra.mxu0 %v1288_v18  ;;  %1276 = vmatpush3.bf16.msra.mxu1 %v1288_v18  ;;  %s1355_s30 = scalar_lea.vmem %s1165_s29, 512  ;;  %p1360_p11 = scmp.lt.s32.totalorder %s1165_s29, %s1165_s29 }
  0x3c   :  { %v1496_v2 = vsub.s32 2, %v1493_v1  ;;  %v1499_v3 = vsub.s32 0, %v1493_v1  ;;  %v1502_v4 = vsub.s32 3, %v1493_v1  ;;  %v1505_v5 = vsub.s32 1, %v1493_v1  ;;  %p1356_p10 = scmp.ne.s32.totalorder %s1165_s29, %s1355_s30  ;;  %p1361_p12 = scmp.lt.s32.totalorder %s1355_s30, %s1355_s30 }
  0x3d   :  { %v1528_v16 = vsub.s32 5, %v1493_v1  ;;  %v1531_v17 = vsub.s32 4, %v1493_v1  ;;  %v1538_v21 = vsub.s32 7, %v1493_v1  ;;  %v1541_v22 = vsub.s32 6, %v1493_v1 }
  0x3e   :  { %v108_v7 = vrot.slane %v1507_v6, %v1496_v2  ;;  %v94_v8 = vrot.slane %v1507_v6, %v1499_v3  ;;  %v115_v9 = vrot.slane %v1507_v6, %v1502_v4  ;;  %v101_v10 = vrot.slane %v1507_v6, %v1505_v5  ;;  %p1362_p13 = por %p1361_p12, %p1360_p11 }
  0x3f   :  { %v213_v12 = vrot.slane %v1517_v11, %v1505_v5  ;;  %v206_v13 = vrot.slane %v1517_v11, %v1499_v3  ;;  %v227_v14 = vrot.slane %v1517_v11, %v1502_v4  ;;  %v220_v15 = vrot.slane %v1517_v11, %v1496_v2 }
  0x40   :  { %110 = vbcast.lane.b32.xlu1 %v108_v7, 256  ;;  %96 = vbcast.lane.b32.xlu0 %v94_v8, 256  ;;  %v129_v19 = vrot.slane %v1507_v6, %v1528_v16  ;;  %v122_v20 = vrot.slane %v1507_v6, %v1531_v17  ;;  %v143_v23 = vrot.slane %v1507_v6, %v1538_v21  ;;  %p1363_p0 = pnand %p1362_p13, %p1356_p10 }
  0x41   :  { %v136_v24 = vrot.slane %v1507_v6, %v1541_v22  ;;  %v241_v25 = vrot.slane %v1517_v11, %v1528_v16  ;;  %v234_v26 = vrot.slane %v1517_v11, %v1531_v17  ;;  %v255_v27 = vrot.slane %v1517_v11, %v1538_v21 }
  0x42   :  { %v248_v28 = vrot.slane %v1517_v11, %v1541_v22  ;;  %v157_v30 = vrot.slane %v1555_v29, %v1505_v5  ;;  %v150_v31 = vrot.slane %v1555_v29, %v1499_v3  ;;  %v171_v32 = vrot.slane %v1555_v29, %v1502_v4 }
  0x43   :  { %v164_v33 = vrot.slane %v1555_v29, %v1496_v2  ;;  %v269_v35 = vrot.slane %v1565_v34, %v1505_v5  ;;  %v262_v36 = vrot.slane %v1565_v34, %v1499_v3  ;;  %v283_v37 = vrot.slane %v1565_v34, %v1502_v4 }
  0x44   :  { %117 = vbcast.lane.b32.xlu1 %v115_v9, 256  ;;  %103 = vbcast.lane.b32.xlu0 %v101_v10, 256  ;;  %v276_v38 = vrot.slane %v1565_v34, %v1496_v2  ;;  %v185_v39 = vrot.slane %v1555_v29, %v1528_v16  ;;  %v178_v40 = vrot.slane %v1555_v29, %v1531_v17 }
  0x45   :  { %v199_v41 = vrot.slane %v1555_v29, %v1538_v21  ;;  %v192_v42 = vrot.slane %v1555_v29, %v1541_v22  ;;  %v297_v43 = vrot.slane %v1565_v34, %v1528_v16  ;;  %v290_v44 = vrot.slane %v1565_v34, %v1531_v17 }
  0x46   :  { %v311_v47 = vrot.slane %v1565_v34, %v1538_v21  ;;  %v304_v48 = vrot.slane %v1565_v34, %v1541_v22  ;;  %v83_v49 = vsel %vm80_vm0, %v81_v45, %v82_v46  ;;  %v86_v54 = vsel %vm80_vm0, %v84_v50, %v85_v51 }
  0x47   :  { %v790_v52 = vrot.slane %v83_v49, %v1499_v3  ;;  %v797_v53 = vrot.slane %v83_v49, %v1505_v5  ;;  %v902_v55 = vrot.slane %v86_v54, %v1499_v3  ;;  %v909_v56 = vrot.slane %v86_v54, %v1505_v5 }
  0x48   :  { %215 = vbcast.lane.b32.xlu1 %v213_v12, 256  ;;  %208 = vbcast.lane.b32.xlu0 %v206_v13, 256  ;;  %v804_v57 = vrot.slane %v83_v49, %v1496_v2  ;;  %v916_v58 = vrot.slane %v86_v54, %v1496_v2  ;;  %v811_v59 = vrot.slane %v83_v49, %v1502_v4 }
  0x49   :  { %v923_v60 = vrot.slane %v86_v54, %v1502_v4  ;;  %v818_v61 = vrot.slane %v83_v49, %v1531_v17  ;;  %v930_v62 = vrot.slane %v86_v54, %v1531_v17  ;;  %v825_v63 = vrot.slane %v83_v49, %v1528_v16 }
  0x4a   :  { %v937_v7 = vrot.slane %v86_v54, %v1528_v16  ;;  %v832_v8 = vrot.slane %v83_v49, %v1541_v22  ;;  %v944_v9 = vrot.slane %v86_v54, %v1541_v22  ;;  %v839_v10 = vrot.slane %v83_v49, %v1538_v21 }
  0x4b   :  { %v951_v12 = vrot.slane %v86_v54, %v1538_v21  ;;  %v1614_v13 = vsel %vm80_vm0, %v82_v46, %v81_v45 }
  0x4c   :  { %229 = vbcast.lane.b32.xlu1 %v227_v14, 256  ;;  %222 = vbcast.lane.b32.xlu0 %v220_v15, 256  ;;  %v1617_v14 = vsel %vm80_vm0, %v85_v51, %v84_v50  ;;  %v846_v15 = vrot.slane %v1614_v13, %v1499_v3 }
  0x4d   :  { %v958_v18 = vrot.slane %v1617_v14, %v1499_v3  ;;  %v867_v3 = vrot.slane %v1614_v13, %v1502_v4 }
  0x50   :  { %131 = vbcast.lane.b32.xlu1 %v129_v19, 256  ;;  %124 = vbcast.lane.b32.xlu0 %v122_v20, 256  ;;  %v853_v19 = vrot.slane %v1614_v13, %v1505_v5  ;;  %v965_v20 = vrot.slane %v1617_v14, %v1505_v5  ;;  %v874_v5 = vrot.slane %v1614_v13, %v1531_v17 }
  0x54   :  { %145 = vbcast.lane.b32.xlu1 %v143_v23, 256  ;;  %138 = vbcast.lane.b32.xlu0 %v136_v24, 256  ;;  %v860_v23 = vrot.slane %v1614_v13, %v1496_v2  ;;  %v972_v24 = vrot.slane %v1617_v14, %v1496_v2  ;;  %v881_v2 = vrot.slane %v1614_v13, %v1528_v16 }
  0x58   :  { %243 = vbcast.lane.b32.xlu1 %v241_v25, 256  ;;  %236 = vbcast.lane.b32.xlu0 %v234_v26, 256  ;;  %v979_v25 = vrot.slane %v1617_v14, %v1502_v4  ;;  %v986_v26 = vrot.slane %v1617_v14, %v1531_v17  ;;  %v1644_v4 = vand.u32 127, %v89_v0  ;;  %v888_v17 = vrot.slane %v1614_v13, %v1541_v22 }
  0x5c   :  { %257 = vbcast.lane.b32.xlu1 %v255_v27, 256  ;;  %250 = vbcast.lane.b32.xlu0 %v248_v28, 256  ;;  %v1414_v27 = vmov 1983009808  }
  0x5d   :  { %v478_v28 = vunpack.c.l.s4 %v1414_v27 }
  0x60   :  { %159 = vbcast.lane.b32.xlu1 %v157_v30, 256  ;;  %152 = vbcast.lane.b32.xlu0 %v150_v31, 256  ;;  %v993_v30 = vrot.slane %v1617_v14, %v1528_v16 }
  0x64   :  { %173 = vbcast.lane.b32.xlu1 %v171_v32, 256  ;;  %166 = vbcast.lane.b32.xlu0 %v164_v33, 256  ;;  %v479_v33 = vunpack.c.0.s8 %v478_v28 }
  0x66   :  { %v1653_v0 = vsub.s32 %v479_v33, %v1493_v1 }
  0x68   :  { %271 = vbcast.lane.b32.xlu1 %v269_v35, 256  ;;  %264 = vbcast.lane.b32.xlu0 %v262_v36, 256  ;;  %v1000_v35 = vrot.slane %v1617_v14, %v1541_v22  ;;  %v1415_v22 = vmov 0.0  }
  0x6c   :  { %285 = vbcast.lane.b32.xlu1 %v283_v37, 256  ;;  %278 = vbcast.lane.b32.xlu0 %v276_v38, 256  ;;  %v895_v37 = vrot.slane %v1614_v13, %v1538_v21  ;;  %v1007_v38 = vrot.slane %v1617_v14, %v1538_v21 }
  0x70   :  { %187 = vbcast.lane.b32.xlu1 %v185_v39, 256  ;;  %180 = vbcast.lane.b32.xlu0 %v178_v40, 256 }
  0x74   :  { %201 = vbcast.lane.b32.xlu1 %v199_v41, 256  ;;  %194 = vbcast.lane.b32.xlu0 %v192_v42, 256 }
  0x78   :  { %299 = vbcast.lane.b32.xlu1 %v297_v43, 256  ;;  %292 = vbcast.lane.b32.xlu0 %v290_v44, 256 }
  0x7c   :  { %313 = vbcast.lane.b32.xlu1 %v311_v47, 256  ;;  %306 = vbcast.lane.b32.xlu0 %v304_v48, 256 }
  0x80   :  { %792 = vbcast.lane.b32.xlu0 %v790_v52, 256  ;;  %799 = vbcast.lane.b32.xlu1 %v797_v53, 256 }
  0x84   :  { %904 = vbcast.lane.b32.xlu0 %v902_v55, 256  ;;  %911 = vbcast.lane.b32.xlu1 %v909_v56, 256 }
  0x88   :  { %806 = vbcast.lane.b32.xlu0 %v804_v57, 256  ;;  %918 = vbcast.lane.b32.xlu1 %v916_v58, 256 }
  0x8c   :  { %813 = vbcast.lane.b32.xlu0 %v811_v59, 256  ;;  %925 = vbcast.lane.b32.xlu1 %v923_v60, 256 }
  0x90   :  { %820 = vbcast.lane.b32.xlu0 %v818_v61, 256  ;;  %932 = vbcast.lane.b32.xlu1 %v930_v62, 256 }
  0x94   :  { %827 = vbcast.lane.b32.xlu0 %v825_v63, 256  ;;  %939 = vbcast.lane.b32.xlu1 %v937_v7, 256 }
  0x98   :  { %834 = vbcast.lane.b32.xlu0 %v832_v8, 256  ;;  %946 = vbcast.lane.b32.xlu1 %v944_v9, 256 }
  0x9c   :  { %841 = vbcast.lane.b32.xlu0 %v839_v10, 256  ;;  %953 = vbcast.lane.b32.xlu1 %v951_v12, 256 }
  0xa0   :  { %848 = vbcast.lane.b32.xlu0 %v846_v15, 256  ;;  %960 = vbcast.lane.b32.xlu1 %v958_v18, 256 }
  0xa4   :  { %855 = vbcast.lane.b32.xlu0 %v853_v19, 256  ;;  %967 = vbcast.lane.b32.xlu1 %v965_v20, 256 }
  0xa8   :  { %862 = vbcast.lane.b32.xlu0 %v860_v23, 256  ;;  %974 = vbcast.lane.b32.xlu1 %v972_v24, 256 }
  0xac   :  { %869 = vbcast.lane.b32.xlu0 %v867_v3, 256  ;;  %981 = vbcast.lane.b32.xlu1 %v979_v25, 256 }
  0xb0   :  { %876 = vbcast.lane.b32.xlu0 %v874_v5, 256  ;;  %988 = vbcast.lane.b32.xlu1 %v986_v26, 256 }
  0xb2   :  { %v111_v31 = vpop.permute.xlu1 %110  ;;  %v97_v32 = vpop.permute.xlu0 %96 }
  0xb3   :  { %vm317_vm1 = vcmp.eq.s32.totalorder %v111_v31, %v1644_v4  ;;  %vm315_vm2 = vcmp.eq.s32.totalorder %v97_v32, %v1644_v4 }
  0xb4   :  { %883 = vbcast.lane.b32.xlu0 %v881_v2, 256  ;;  %995 = vbcast.lane.b32.xlu1 %v993_v30, 256  ;;  %v1193_v39 = vsel %vm317_vm1, 1.0, %v1415_v22  ;;  %v1191_v40 = vsel %vm315_vm2, 1.0, %v1415_v22 }
  0xb6   :  { %v118_v36 = vpop.permute.xlu1 %117  ;;  %v104_v16 = vpop.permute.xlu0 %103 }
  0xb7   :  { %vm318_vm3 = vcmp.eq.s32.totalorder %v118_v36, %v1644_v4  ;;  %vm316_vm4 = vcmp.eq.s32.totalorder %v104_v16, %v1644_v4 }
  0xb8   :  { %v1194_v41 = vsel %vm318_vm3, 1.0, %v1415_v22  ;;  %v1192_v42 = vsel %vm316_vm4, 1.0, %v1415_v22  ;;  %890 = vbcast.lane.b32.xlu0 %v888_v17, 256  ;;  %1002 = vbcast.lane.b32.xlu1 %v1000_v35, 256 }
  0xb9   :  { %v1224_v43 = vpack.c.bf16 %v1194_v41, %v1193_v39  ;;  %v1223_v44 = vpack.c.bf16 %v1192_v42, %v1191_v40 }
  0xba   :  { %v216_v45 = vpop.permute.xlu1 %215  ;;  %v209_v46 = vpop.permute.xlu0 %208 }
  0xbb   :  { %vm332_vm5 = vcmp.eq.s32.totalorder %v216_v45, %v1644_v4  ;;  %vm331_vm6 = vcmp.eq.s32.totalorder %v209_v46, %v1644_v4  ;;  %v483_v21 = vrot.slane %v1223_v44, %v1653_v0  ;;  %v490_v47 = vrot.slane %v1224_v43, %v1653_v0 }
  0xbc   :  { %v1208_v48 = vsel %vm332_vm5, 1.0, %v1415_v22  ;;  %v1207_v49 = vsel %vm331_vm6, 1.0, %v1415_v22  ;;  %897 = vbcast.lane.b32.xlu0 %v895_v37, 256  ;;  %1009 = vbcast.lane.b32.xlu1 %v1007_v38, 256 }
  0xbd   :  { %v491_v50 = vcombine.low %v483_v21, %v490_v47  ;;  %v1231_v53 = vpack.c.bf16 %v1208_v48, %v1207_v49 }
  0xbe   :  { %v230_v51 = vpop.permute.xlu1 %229  ;;  %v223_v52 = vpop.permute.xlu0 %222 }
  0xbf   :  { %vm334_vm8 = vcmp.eq.s32.totalorder %v230_v51, %v1644_v4  ;;  %vm333_vm9 = vcmp.eq.s32.totalorder %v223_v52, %v1644_v4  ;;  %1259 = vmatprep.mubr.msk.bf16.mxu0 %vm617_vm7, %v491_v50  ;;  %v551_v59 = vrot.slane %v1231_v53, %v1653_v0 }
  0xc0   :  { %v1210_v54 = vsel %vm334_vm8, 1.0, %v1415_v22  ;;  %v1209_v55 = vsel %vm333_vm9, 1.0, %v1415_v22 }
  0xc1   :  { %v1232_v56 = vpack.c.bf16 %v1210_v54, %v1209_v55 }
  0xc2   :  { %v132_v57 = vpop.permute.xlu1 %131  ;;  %v125_v58 = vpop.permute.xlu0 %124 }
  0xc3   :  { %vm320_vm10 = vcmp.eq.s32.totalorder %v132_v57, %v1644_v4  ;;  %vm319_vm11 = vcmp.eq.s32.totalorder %v125_v58, %v1644_v4  ;;  %v558_v60 = vrot.slane %v1232_v56, %v1653_v0 }
  0xc4   :  { %v1196_v61 = vsel %vm320_vm10, 1.0, %v1415_v22  ;;  %v1195_v62 = vsel %vm319_vm11, 1.0, %v1415_v22 }
  0xc5   :  { %v559_v63 = vcombine.low %v551_v59, %v558_v60  ;;  %v1225_v9 = vpack.c.bf16 %v1196_v61, %v1195_v62 }
  0xc6   :  { %v146_v7 = vpop.permute.xlu1 %145  ;;  %v139_v8 = vpop.permute.xlu0 %138 }
  0xc7   :  { %vm322_vm12 = vcmp.eq.s32.totalorder %v146_v7, %v1644_v4  ;;  %vm321_vm13 = vcmp.eq.s32.totalorder %v139_v8, %v1644_v4  ;;  %1267 = vmatprep.mubr.msk.bf16.mxu1 %vm617_vm7, %v559_v63  ;;  %v500_v18 = vrot.slane %v1225_v9, %v1653_v0 }
  0xc8   :  { %v1198_v10 = vsel %vm322_vm12, 1.0, %v1415_v22  ;;  %v1197_v12 = vsel %vm321_vm13, 1.0, %v1415_v22 }
  0xc9   :  { %v1226_v13 = vpack.c.bf16 %v1198_v10, %v1197_v12 }
  0xca   :  { %v244_v14 = vpop.permute.xlu1 %243  ;;  %v237_v15 = vpop.permute.xlu0 %236 }
  0xcb   :  { %v507_v19 = vrot.slane %v1226_v13, %v1653_v0  ;;  %vm336_vm14 = vcmp.eq.s32.totalorder %v244_v14, %v1644_v4  ;;  %vm335_vm15 = vcmp.eq.s32.totalorder %v237_v15, %v1644_v4 }
  0xcc   :  { %v1212_v20 = vsel %vm336_vm14, 1.0, %v1415_v22  ;;  %v1211_v23 = vsel %vm335_vm15, 1.0, %v1415_v22 }
  0xcd   :  { %v508_v24 = vcombine.low %v500_v18, %v507_v19  ;;  %v1233_v5 = vpack.c.bf16 %v1212_v20, %v1211_v23 }
  0xce   :  { %v258_v3 = vpop.permute.xlu1 %257  ;;  %v251_v25 = vpop.permute.xlu0 %250 }
  0xcf   :  { %vm338_vm0 = vcmp.eq.s32.totalorder %v258_v3, %v1644_v4  ;;  %vm337_vm1 = vcmp.eq.s32.totalorder %v251_v25, %v1644_v4  ;;  %1260 = vmatmul.mubr.msk.bf16.vlgmr.msra.gmra.mrb[0].mxu0 %vm617_vm7, %v508_v24  ;;  %v568_v31 = vrot.slane %v1233_v5, %v1653_v0 }
  0xd0   :  { %v1214_v26 = vsel %vm338_vm0, 1.0, %v1415_v22  ;;  %v1213_v27 = vsel %vm337_vm1, 1.0, %v1415_v22 }
  0xd1   :  { %v1234_v28 = vpack.c.bf16 %v1214_v26, %v1213_v27 }
  0xd2   :  { %v160_v2 = vpop.permute.xlu1 %159  ;;  %v153_v30 = vpop.permute.xlu0 %152 }
  0xd3   :  { %v575_v32 = vrot.slane %v1234_v28, %v1653_v0  ;;  %vm324_vm2 = vcmp.eq.s32.totalorder %v160_v2, %v1644_v4  ;;  %vm323_vm3 = vcmp.eq.s32.totalorder %v153_v30, %v1644_v4 }
  0xd4   :  { %v1200_v33 = vsel %vm324_vm2, 1.0, %v1415_v22  ;;  %v1199_v17 = vsel %vm323_vm3, 1.0, %v1415_v22 }
  0xd5   :  { %v576_v35 = vcombine.low %v568_v31, %v575_v32  ;;  %v1227_v37 = vpack.c.bf16 %v1200_v33, %v1199_v17 }
  0xd6   :  { %v174_v36 = vpop.permute.xlu1 %173  ;;  %v167_v16 = vpop.permute.xlu0 %166 }
  0xd7   :  { %vm326_vm4 = vcmp.eq.s32.totalorder %v174_v36, %v1644_v4  ;;  %vm325_vm5 = vcmp.eq.s32.totalorder %v167_v16, %v1644_v4  ;;  %1268 = vmatmul.mubr.msk.bf16.vlgmr.msra.gmra.mrb[0].mxu1 %vm617_vm7, %v576_v35  ;;  %v517_v43 = vrot.slane %v1227_v37, %v1653_v0 }
  0xd8   :  { %v1202_v38 = vsel %vm326_vm4, 1.0, %v1415_v22  ;;  %v1201_v39 = vsel %vm325_vm5, 1.0, %v1415_v22  ;;  %vm1075_vm4 = vcmask 125952  }
  0xd9   :  { %v1228_v40 = vpack.c.bf16 %v1202_v38, %v1201_v39 }
  0xda   :  { %v272_v41 = vpop.permute.xlu1 %271  ;;  %v265_v42 = vpop.permute.xlu0 %264 }
  0xdb   :  { %v524_v44 = vrot.slane %v1228_v40, %v1653_v0  ;;  %vm340_vm6 = vcmp.eq.s32.totalorder %v272_v41, %v1644_v4  ;;  %vm339_vm8 = vcmp.eq.s32.totalorder %v265_v42, %v1644_v4 }
  0xdc   :  { %v1216_v45 = vsel %vm340_vm6, 1.0, %v1415_v22  ;;  %v1215_v46 = vsel %vm339_vm8, 1.0, %v1415_v22 }
  0xdd   :  { %v525_v21 = vcombine.low %v517_v43, %v524_v44  ;;  %v1235_v49 = vpack.c.bf16 %v1216_v45, %v1215_v46 }
  0xde   :  { %v286_v47 = vpop.permute.xlu1 %285  ;;  %v279_v48 = vpop.permute.xlu0 %278 }
  0xdf   :  { %vm342_vm9 = vcmp.eq.s32.totalorder %v286_v47, %v1644_v4  ;;  %vm341_vm10 = vcmp.eq.s32.totalorder %v279_v48, %v1644_v4  ;;  %1263 = vmatprep.mubr.msk.bf16.mxu0 %vm617_vm7, %v525_v21  ;;  %v585_v55 = vrot.slane %v1235_v49, %v1653_v0 }
  0xe0   :  { %v1218_v50 = vsel %vm342_vm9, 1.0, %v1415_v22  ;;  %v1217_v51 = vsel %vm341_vm10, 1.0, %v1415_v22 }
  0xe1   :  { %v1236_v52 = vpack.c.bf16 %v1218_v50, %v1217_v51 }
  0xe2   :  { %v188_v53 = vpop.permute.xlu1 %187  ;;  %v181_v54 = vpop.permute.xlu0 %180 }
  0xe3   :  { %v592_v56 = vrot.slane %v1236_v52, %v1653_v0  ;;  %vm328_vm11 = vcmp.eq.s32.totalorder %v188_v53, %v1644_v4  ;;  %vm327_vm12 = vcmp.eq.s32.totalorder %v181_v54, %v1644_v4 }
  0xe4   :  { %v1204_v57 = vsel %vm328_vm11, 1.0, %v1415_v22  ;;  %v1203_v58 = vsel %vm327_vm12, 1.0, %v1415_v22 }
  0xe5   :  { %v593_v59 = vcombine.low %v585_v55, %v592_v56  ;;  %v1229_v62 = vpack.c.bf16 %v1204_v57, %v1203_v58 }
  0xe6   :  { %v202_v60 = vpop.permute.xlu1 %201  ;;  %v195_v61 = vpop.permute.xlu0 %194 }
  0xe7   :  { %vm330_vm13 = vcmp.eq.s32.totalorder %v202_v60, %v1644_v4  ;;  %vm329_vm14 = vcmp.eq.s32.totalorder %v195_v61, %v1644_v4  ;;  %1271 = vmatprep.mubr.msk.bf16.mxu1 %vm617_vm7, %v593_v59  ;;  %v534_v12 = vrot.slane %v1229_v62, %v1653_v0 }
  0xe8   :  { %v1206_v63 = vsel %vm330_vm13, 1.0, %v1415_v22  ;;  %v1205_v7 = vsel %vm329_vm14, 1.0, %v1415_v22 }
  0xe9   :  { %v1230_v8 = vpack.c.bf16 %v1206_v63, %v1205_v7 }
  0xea   :  { %v300_v9 = vpop.permute.xlu1 %299  ;;  %v293_v10 = vpop.permute.xlu0 %292 }
  0xeb   :  { %v541_v13 = vrot.slane %v1230_v8, %v1653_v0  ;;  %vm344_vm15 = vcmp.eq.s32.totalorder %v300_v9, %v1644_v4  ;;  %vm343_vm0 = vcmp.eq.s32.totalorder %v293_v10, %v1644_v4 }
  0xec   :  { %v1220_v14 = vsel %vm344_vm15, 1.0, %v1415_v22  ;;  %v1219_v15 = vsel %vm343_vm0, 1.0, %v1415_v22 }
  0xed   :  { %v542_v18 = vcombine.low %v534_v12, %v541_v13  ;;  %v1237_v23 = vpack.c.bf16 %v1220_v14, %v1219_v15 }
  0xee   :  { %v314_v19 = vpop.permute.xlu1 %313  ;;  %v307_v20 = vpop.permute.xlu0 %306 }
  0xef   :  { %vm346_vm1 = vcmp.eq.s32.totalorder %v314_v19, %v1644_v4  ;;  %vm345_vm2 = vcmp.eq.s32.totalorder %v307_v20, %v1644_v4  ;;  %1264 = vmatmul.mubr.msk.bf16.gmra.mrb[4].mxu0 %vm617_vm7, %v542_v18  ;;  %v602_v5 = vrot.slane %v1237_v23, %v1653_v0 }
  0xf0   :  { %v1222_v24 = vsel %vm346_vm1, 1.0, %v1415_v22  ;;  %v1221_v3 = vsel %vm345_vm2, 1.0, %v1415_v22 }
  0xf1   :  { %v1238_v25 = vpack.c.bf16 %v1222_v24, %v1221_v3 }
  0xf2   :  { %v793_v28 = vpop.permute.xlu0 %792  ;;  %v800_v30 = vpop.permute.xlu1 %799 }
  0xf3   :  { %v609_v26 = vrot.slane %v1238_v25, %v1653_v0  ;;  %vm1012_vm5 = vcmp.eq.s32.totalorder %v800_v30, %v1644_v4 }
  0xf5   :  { %v610_v27 = vcombine.low %v602_v5, %v609_v26 }
  0xf6   :  { %v905_v2 = vpop.permute.xlu0 %904  ;;  %v912_v32 = vpop.permute.xlu1 %911 }
  0xf7   :  { %1272 = vmatmul.mubr.msk.bf16.gmra.mrb[4].mxu1 %vm617_vm7, %v610_v27  ;;  %vm1011_vm7 = vcmp.eq.s32.totalorder %v793_v28, %v1644_v4  ;;  %vm1027_vm10 = vcmp.eq.s32.totalorder %v905_v2, %v1644_v4  ;;  %vm1028_vm11 = vcmp.eq.s32.totalorder %v912_v32, %v1644_v4 }
  0xfa   :  { %v807_v31 = vpop.permute.xlu0 %806  ;;  %v1745_v17 = vpop.permute.xlu1 %918 }
  0xfb   :  { %vm1013_vm3 = vcmp.eq.s32.totalorder %v807_v31, %v1644_v4  ;;  %vm1029_vm12 = vcmp.eq.s32.totalorder %v1745_v17, %v1644_v4 }
  0xfe   :  { %v814_v33 = vpop.permute.xlu0 %813  ;;  %v1747_v36 = vpop.permute.xlu1 %925 }
  0xff   :  { %vm1014_vm6 = vcmp.eq.s32.totalorder %v814_v33, %v1644_v4  ;;  %vm1030_vm14 = vcmp.eq.s32.totalorder %v1747_v36, %v1644_v4 }
 0x102   :  { %v821_v35 = vpop.permute.xlu0 %820  ;;  %v1749_v16 = vpop.permute.xlu1 %932 }
 0x103   :  { %vm1015_vm8 = vcmp.eq.s32.totalorder %v821_v35, %v1644_v4  ;;  %vm1031_vm15 = vcmp.eq.s32.totalorder %v1749_v16, %v1644_v4 }
 0x106   :  { %v828_v22 = vpop.permute.xlu0 %827  ;;  %v1751_v38 = vpop.permute.xlu1 %939 }
 0x107   :  { %vm1016_vm9 = vcmp.eq.s32.totalorder %v828_v22, %v1644_v4  ;;  %vm1032_vm1 = vcmp.eq.s32.totalorder %v1751_v38, %v1644_v4 }
 0x10a   :  { %v835_v37 = vpop.permute.xlu0 %834  ;;  %v1753_v39 = vpop.permute.xlu1 %946 }
 0x10b   :  { %vm1017_vm13 = vcmp.eq.s32.totalorder %v835_v37, %v1644_v4  ;;  %vm1033_vm2 = vcmp.eq.s32.totalorder %v1753_v39, %v1644_v4 }
 0x10e   :  { %v842_v0 = vpop.permute.xlu0 %841  ;;  %v1757_v42 = vpop.permute.xlu1 %953 }
 0x10f   :  { %vm1018_vm0 = vcmp.eq.s32.totalorder %v842_v0, %v1644_v4 }
 0x112   :  { %v1755_v40 = vpop.permute.xlu0 %848  ;;  %v1769_v56 = vpop.permute.xlu1 %960 }
 0x116   :  { %v1764_v49 = vpop.permute.xlu0 %855  ;;  %v1791_v24 = vpop.permute.xlu1 %967 }
 0x11a   :  { %v1778_v13 = vpop.permute.xlu0 %862 }
 0x11e   :  { %v870_v37 = vpop.permute.xlu0 %869 }
 0x122   :  { %v877_v39 = vpop.permute.xlu0 %876 }
 0x1a2   :  { %v1261_v41 = vpop.f32.mrb[0].mxu0 }
 0x1a3   :  { %v676_v43 = vpop.f32.mrb[1].mxu0  ;;  %v757_v50 = vcombine.high %v1261_v41, %v1261_v41  ;;  %v1047_v58 = vsel %vm1015_vm8, %v1261_v41, 0.0  ;;  %vm1022_vm8 = vcmp.eq.s32.totalorder %v870_v37, %v1644_v4 }
 0x1a4   :  { %v755_v44 = vcombine.high %v676_v43, %v676_v43  ;;  %v1043_v45 = vsel %vm1011_vm7, %v676_v43, 0.0  ;;  %v1262_v46 = vpop.f32.mrb[2].mxu0  ;;  %v1083_v14 = vsel %vm1075_vm4, %v1047_v58, 0.0  ;;  %vm1034_vm7 = vcmp.eq.s32.totalorder %v1757_v42, %v1644_v4 }
 0x1a5   :  { %v679_v21 = vpop.f32.mrb[3].mxu0  ;;  %v1076_v51 = vsel %vm1075_vm4, %v1043_v45, 0.0  ;;  %v1048_v61 = vsel %vm1016_vm9, %v757_v50, 0.0  ;;  %v758_v7 = vcombine.high %v1262_v46, %v1262_v46  ;;  %v1049_v19 = vsel %vm1017_vm13, %v1262_v46, 0.0  ;;  %v1812_v45 = vpop.permute.xlu1 %974 }
 0x1a6   :  { %v1044_v47 = vsel %vm1012_vm5, %v755_v44, 0.0  ;;  %v756_v48 = vcombine.high %v679_v21, %v679_v21  ;;  %v1045_v53 = vsel %vm1013_vm3, %v679_v21, 0.0  ;;  %v1085_v18 = vsel %vm1075_vm4, %v1048_v61, 0.0 }
 0x1a7   :  { %v1077_v52 = vsel %vm1075_vm4, %v1044_v47, 0.0  ;;  %v1079_v57 = vsel %vm1075_vm4, %v1045_v53, 0.0  ;;  %v1050_v28 = vsel %vm1018_vm0, %v758_v7, 0.0  ;;  %v1087_v31 = vsel %vm1075_vm4, %v1049_v19, 0.0 }
 0x1a8   :  { %v1078_v54 = vadd.f32 %v1077_v52, %v1076_v51  ;;  %v1046_v55 = vsel %vm1014_vm6, %v756_v48, 0.0  ;;  %v1089_v0 = vsel %vm1075_vm4, %v1050_v28, 0.0  ;;  %vm1019_vm3 = vcmp.eq.s32.totalorder %v1755_v40, %v1644_v4 }
 0x1a9   :  { %v1081_v62 = vsel %vm1075_vm4, %v1046_v55, 0.0  ;;  %v1819_v53 = vpop.permute.xlu1 %981  ;;  %vm1021_vm5 = vcmp.eq.s32.totalorder %v1778_v13, %v1644_v4  ;;  %vm1020_vm6 = vcmp.eq.s32.totalorder %v1764_v49, %v1644_v4  ;;  %vm1023_vm9 = vcmp.eq.s32.totalorder %v877_v39, %v1644_v4 }
 0x1aa   :  { %v1080_v59 = vadd.f32 %v1079_v57, %v1078_v54  ;;  %v1269_v60 = vpop.f32.mrb[0].mxu1  ;;  %v884_v57 = vpop.permute.xlu0 %883  ;;  %vm1037_vm13 = vcmp.eq.s32.totalorder %v1812_v45, %v1644_v4 }
 0x1ab   :  { %v708_v63 = vpop.f32.mrb[1].mxu1  ;;  %v765_v2 = vcombine.high %v1269_v60, %v1269_v60  ;;  %v1063_v17 = vsel %vm1031_vm15, %v1269_v60, 0.0 }
 0x1ac   :  { %v1082_v8 = vadd.f32 %v1081_v62, %v1080_v59  ;;  %v763_v9 = vcombine.high %v708_v63, %v708_v63  ;;  %v1059_v10 = vsel %vm1027_vm10, %v708_v63, 0.0  ;;  %v1270_v12 = vpop.f32.mrb[2].mxu1  ;;  %v1114_v46 = vsel %vm1075_vm4, %v1063_v17, 0.0 }
 0x1ad   :  { %v711_v15 = vpop.f32.mrb[3].mxu1  ;;  %v1107_v3 = vsel %vm1075_vm4, %v1059_v10, 0.0  ;;  %v1064_v43 = vsel %vm1032_vm1, %v765_v2, 0.0  ;;  %v766_v36 = vcombine.high %v1270_v12, %v1270_v12  ;;  %v1065_v16 = vsel %vm1033_vm2, %v1270_v12, 0.0  ;;  %v1822_v58 = vpop.permute.xlu1 %988 }
 0x1ae   :  { %v1084_v20 = vadd.f32 %v1083_v14, %v1082_v8  ;;  %v1060_v23 = vsel %vm1028_vm11, %v763_v9, 0.0  ;;  %v764_v5 = vcombine.high %v711_v15, %v711_v15  ;;  %v1061_v26 = vsel %vm1029_vm12, %v711_v15, 0.0  ;;  %v891_v60 = vpop.permute.xlu0 %890 }
 0x1af   :  { %v1108_v25 = vsel %vm1075_vm4, %v1060_v23, 0.0  ;;  %v1110_v33 = vsel %vm1075_vm4, %v1061_v26, 0.0  ;;  %v1116_v47 = vsel %vm1075_vm4, %v1064_v43, 0.0  ;;  %v1066_v48 = vsel %vm1034_vm7, %v766_v36, 0.0 }
 0x1b0   :  { %v1086_v27 = vadd.f32 %v1085_v18, %v1084_v20  ;;  %v1109_v30 = vadd.f32 %v1108_v25, %v1107_v3  ;;  %v1062_v32 = vsel %vm1030_vm14, %v764_v5, 0.0  ;;  %v1118_v51 = vsel %vm1075_vm4, %v1065_v16, 0.0 }
 0x1b1   :  { %v1112_v38 = vsel %vm1075_vm4, %v1062_v32, 0.0  ;;  %v1120_v54 = vsel %vm1075_vm4, %v1066_v48, 0.0  ;;  %v996_v10 = vpop.permute.xlu1 %995  ;;  %vm1024_vm10 = vcmp.eq.s32.totalorder %v884_v57, %v1644_v4  ;;  %vm1035_vm11 = vcmp.eq.s32.totalorder %v1769_v56, %v1644_v4 }
 0x1b2   :  { %v1088_v35 = vadd.f32 %v1087_v31, %v1086_v27  ;;  %v1111_v22 = vadd.f32 %v1110_v33, %v1109_v30  ;;  %vm1036_vm12 = vcmp.eq.s32.totalorder %v1791_v24, %v1644_v4  ;;  %v898_v25 = vpop.permute.xlu0 %897  ;;  %vm1038_vm14 = vcmp.eq.s32.totalorder %v1819_v53, %v1644_v4 }
 0x1b3   :  { %vm1025_vm15 = vcmp.eq.s32.totalorder %v891_v60, %v1644_v4  ;;  %vm1039_vm0 = vcmp.eq.s32.totalorder %v1822_v58, %v1644_v4  ;;  %vm1026_vm1 = vcmp.eq.s32.totalorder %v898_v25, %v1644_v4  ;;  %vm1040_vm2 = vcmp.eq.s32.totalorder %v996_v10, %v1644_v4 }
 0x1b4   :  { %v1090_v41 = vadd.f32 %v1089_v0, %v1088_v35  ;;  %v1113_v44 = vadd.f32 %v1112_v38, %v1111_v22 }
 0x1b5   :  { %v1003_v30 = vpop.permute.xlu1 %1002 }
 0x1b6   :  { %v1115_v21 = vadd.f32 %v1114_v46, %v1113_v44  ;;  %vm1041_vm7 = vcmp.eq.s32.totalorder %v1003_v30, %v1644_v4 }
 0x1b8   :  { %v1117_v50 = vadd.f32 %v1116_v47, %v1115_v21 }
 0x1ba   :  { %v1119_v52 = vadd.f32 %v1118_v51, %v1117_v50  ;;  %v1010_v51 = vpop.permute.xlu1 %1009 }
 0x1bc   :  { %v1121_v55 = vadd.f32 %v1120_v54, %v1119_v52 }
 0x1c2   :  { %v1265_v59 = vpop.f32.mrb[4].mxu0 }
 0x1c3   :  { %v692_v42 = vpop.f32.mrb[5].mxu0  ;;  %v761_v12 = vcombine.high %v1265_v59, %v1265_v59  ;;  %v1055_v23 = vsel %vm1023_vm9, %v1265_v59, 0.0 }
 0x1c4   :  { %v759_v61 = vcombine.high %v692_v42, %v692_v42  ;;  %v1051_v62 = vsel %vm1019_vm3, %v692_v42, 0.0  ;;  %v1266_v63 = vpop.f32.mrb[6].mxu0  ;;  %v1099_v35 = vsel %vm1075_vm4, %v1055_v23, 0.0  ;;  %vm1042_vm3 = vcmp.eq.s32.totalorder %v1010_v51, %v1644_v4 }
 0x1c5   :  { %v1091_v7 = vsel %vm1075_vm4, %v1051_v62, 0.0  ;;  %v695_v8 = vpop.f32.mrb[7].mxu0  ;;  %v1056_v5 = vsel %vm1024_vm10, %v761_v12, 0.0  ;;  %v762_v28 = vcombine.high %v1266_v63, %v1266_v63  ;;  %v1057_v37 = vsel %vm1025_vm15, %v1266_v63, 0.0 }
 0x1c6   :  { %v1052_v9 = vsel %vm1020_vm6, %v759_v61, 0.0  ;;  %v1092_v40 = vadd.f32 %v1091_v7, %v1090_v41  ;;  %v760_v15 = vcombine.high %v695_v8, %v695_v8  ;;  %v1053_v18 = vsel %vm1021_vm5, %v695_v8, 0.0 }
 0x1c7   :  { %v1093_v14 = vsel %vm1075_vm4, %v1052_v9, 0.0  ;;  %v1095_v20 = vsel %vm1075_vm4, %v1053_v18, 0.0  ;;  %v1101_v56 = vsel %vm1075_vm4, %v1056_v5, 0.0  ;;  %v1058_v46 = vsel %vm1026_vm1, %v762_v28, 0.0 }
 0x1c8   :  { %v1094_v49 = vadd.f32 %v1093_v14, %v1092_v40  ;;  %v1054_v19 = vsel %vm1022_vm8, %v760_v15, 0.0  ;;  %v1103_v48 = vsel %vm1075_vm4, %v1057_v37, 0.0  ;;  %v1105_v54 = vsel %vm1075_vm4, %v1058_v46, 0.0 }
 0x1c9   :  { %v1097_v26 = vsel %vm1075_vm4, %v1054_v19, 0.0  ;;  %vm75_vm5 = vcmask 31744  }
 0x1ca   :  { %v1096_v3 = vadd.f32 %v1095_v20, %v1094_v49  ;;  %v1273_v13 = vpop.f32.mrb[4].mxu1  ;;  %76 = vst.msk [vmem:[#allocation8] sm:$0xff] %vm75_vm5, %v1507_v6  ;;  %77 = vst.msk [vmem:[#allocation8 + $0x8] sm:$0xff] %vm75_vm5, %v1555_v29 }
 0x1cb   :  { %v724_v27 = vpop.f32.mrb[5].mxu1  ;;  %v769_v16 = vcombine.high %v1273_v13, %v1273_v13  ;;  %v1071_v39 = vsel %vm1039_vm0, %v1273_v13, 0.0  ;;  %78 = vst.msk [vmem:[#allocation8 + $0x10] sm:$0xff] %vm75_vm5, %v1517_v11  ;;  %79 = vst.msk [vmem:[#allocation8 + $0x18] sm:$0xff] %vm75_vm5, %v1565_v34 }
 0x1cc   :  { %v1098_v2 = vadd.f32 %v1097_v26, %v1096_v3  ;;  %v767_v31 = vcombine.high %v724_v27, %v724_v27  ;;  %v1067_v32 = vsel %vm1035_vm11, %v724_v27, 0.0  ;;  %v1274_v33 = vpop.f32.mrb[6].mxu1  ;;  %v1130_v60 = vsel %vm1075_vm4, %v1071_v39, 0.0 }
 0x1cd   :  { %v1122_v17 = vsel %vm1075_vm4, %v1067_v32, 0.0  ;;  %v727_v22 = vpop.f32.mrb[7].mxu1  ;;  %v1072_v57 = vsel %vm1040_vm2, %v769_v16, 0.0  ;;  %v770_v59 = vcombine.high %v1274_v33, %v1274_v33  ;;  %v1073_v61 = vsel %vm1041_vm7, %v1274_v33, 0.0 }
 0x1ce   :  { %v1100_v0 = vadd.f32 %v1099_v35, %v1098_v2  ;;  %v1068_v38 = vsel %vm1036_vm12, %v767_v31, 0.0  ;;  %v1123_v41 = vadd.f32 %v1122_v17, %v1121_v55  ;;  %v768_v36 = vcombine.high %v727_v22, %v727_v22 }
 0x1cf   :  { %v1124_v43 = vsel %vm1075_vm4, %v1068_v38, 0.0  ;;  %v1069_v44 = vsel %vm1037_vm13, %v727_v22, 0.0  ;;  %v1132_v63 = vsel %vm1075_vm4, %v1072_v57, 0.0  ;;  %v1074_v7 = vsel %vm1042_vm3, %v770_v59, 0.0 }
 0x1d0   :  { %v1125_v21 = vadd.f32 %v1124_v43, %v1123_v41  ;;  %v1102_v47 = vadd.f32 %v1101_v56, %v1100_v0  ;;  %v1070_v24 = vsel %vm1038_vm14, %v768_v36, 0.0  ;;  %v1126_v50 = vsel %vm1075_vm4, %v1069_v44, 0.0 }
 0x1d1   :  { %v1128_v55 = vsel %vm1075_vm4, %v1070_v24, 0.0  ;;  %v1134_v9 = vsel %vm1075_vm4, %v1073_v61, 0.0  ;;  %v1136_v10 = vsel %vm1075_vm4, %v1074_v7, 0.0 }
 0x1d2   :  { %v1127_v45 = vadd.f32 %v1126_v50, %v1125_v21  ;;  %v1104_v52 = vadd.f32 %v1103_v48, %v1102_v47 }
 0x1d4   :  { %v1129_v42 = vadd.f32 %v1128_v55, %v1127_v45  ;;  %v1106_v53 = vadd.f32 %v1105_v54, %v1104_v52 }
 0x1d6   :  { %v1131_v58 = vadd.f32 %v1130_v60, %v1129_v42  ;;  %v1138_v62 = vsel %vm1075_vm4, %v1106_v53, 0.0 }
 0x1d7   :  { %1139 = vadd.xlane.f32.xlu0 %v1138_v62 }
 0x1d8   :  { %v1133_v8 = vadd.f32 %v1132_v63, %v1131_v58 }
 0x1da   :  { %v1135_v40 = vadd.f32 %v1134_v9, %v1133_v8 }
 0x1dc   :  { %v1137_v12 = vadd.f32 %v1136_v10, %v1135_v40 }
 0x1de   :  { %v1141_v14 = vsel %vm1075_vm4, %v1137_v12, 0.0 }
 0x1df   :  { %1142 = vadd.xlane.f32.xlu1 %v1141_v14 }
 0x1e0   :  { %1366 = shalt.err (!%p1363_p0)
}
 0x1e1   :  { %s1367_s7 = scalar_lea.hbm %s1920_s3, 512 }
 0x1e2   :  { %p1368_p1 = scmp.ne.s32.totalorder %s1920_s3, %s1367_s7  ;;  %p1371_p2 = scmp.lt.u32.totalorder %s1367_s7, %s1920_s3 }
 0x1e4   :  { %p1373_p3 = pnand %p1371_p2, %p1368_p1 }
 0x1e6   :  { %1376 = shalt.err (!%p1373_p3)
}
 0x1e7   :  { %1170 = dma.vmem_to_hbm [thread:$0]  %s1165_s29, 512, %s1920_s3, [#allocation4], %s1409_s27, %s1409_s27, %s1410_s28   ;;  %v1148_v6 = vsub.s32 %v1644_v4, %v1493_v1  ;;  %vm1154_vm4 = vcmask 1041409   ;;  %vm1157_vm6 = vcmask 25600  }
 0x1e8   :  { %s1417_s13 = smov [#allocation9]  }
 0x1e9   :  { %s1177_s14 = sshll.u32 %s1417_s13, 4  ;;  %s1178_s14 = int_to_ptr.vmem [resolvable:$true] %s1177_s14 }
 0x1ea   :  { %s1377_s15 = scalar_lea.vmem %s1178_s14, 32  ;;  %p1382_p5 = scmp.lt.s32.totalorder %s1178_s14, %s1178_s14 }
 0x1eb   :  { %p1378_p4 = scmp.ne.s32.totalorder %s1178_s14, %s1377_s15  ;;  %p1383_p6 = scmp.lt.s32.totalorder %s1377_s15, %s1377_s15 }
 0x1ed   :  { %p1384_p7 = por %p1383_p6, %p1382_p5 }
 0x1ef   :  { %p1385_p8 = pnand %p1384_p7, %p1378_p4 }
 0x264   :  { %v1140_v11 = vpop.xlane.xlu0 %1139 }
 0x265   :  { %v1149_v34 = vrot.slane %v1140_v11, %v1148_v6 }
 0x26c   :  { %v1143_v29 = vpop.xlane.xlu1 %1142 }
 0x26d   :  { %v1153_v15 = vrot.slane %v1143_v29, %v1148_v6 }
 0x26f   :  { %v1155_v18 = vsel %vm1154_vm4, %v1153_v15, %v1149_v34 }
 0x270   :  { %1158 = vst.msk [vmem:[#allocation9] sm:$0x3] %vm1157_vm6, %v1155_v18 }
 0x271   :  { %1388 = shalt.err (!%p1385_p8)
}
 0x272   :  { %s1389_s28 = scalar_lea.hbm %s1921_s4, 32 }
 0x273   :  { %p1390_p9 = scmp.ne.s32.totalorder %s1921_s4, %s1389_s28  ;;  %p1393_p10 = scmp.lt.u32.totalorder %s1389_s28, %s1921_s4 }
 0x275   :  { %p1395_p11 = pnand %p1393_p10, %p1390_p9 }
 0x277   :  { %1398 = shalt.err (!%p1395_p11)
}
 0x278   :  { %1180 = dma.vmem_to_hbm [thread:$0]  %s1178_s14, 32, %s1921_s4, [#allocation10]  }
 0x279   :  { %1403 = dma.done.wait [#allocation4], 512  }
 0x27a   :  { %1404 = vsyncadd [#allocation4], 4294966784 }
 0x27b   :  { %1405 = dma.done.wait [#allocation10], 32  }
 0x27c   :  { %1406 = vsyncadd [#allocation10], 4294967264 }
 0x27d   :  { %1187 = vsyncpa [#allocation3], 1 }
 0x27e   :  { %1188 = vsyncpa [#allocation6], 1 }
 0x27f   :  { %1189 = vsyncpa [#allocation4], 1 }
 0x280   :  { %1190 = vsyncpa [#allocation10], 1 }

</bundles_post_ra>
